<compile_context>
chip_gen: v7x
topology: tpu7x:2x2x1
jax: 0.10.0
libtpu: 0.0.40
codegen_flags: <defaults>
</compile_context>

<pallas_src>
import functools

import jax
import jax.numpy as jnp
from jax.experimental import pallas as pl
from jax.experimental.pallas import tpu as pltpu

BN_EPS = 1e-5


# ----------------------------------------------------------------------------
# Fused Pallas kernel: the whole bottleneck_dconv block on one row-tile
# ----------------------------------------------------------------------------
def _bottleneck_dconv_kernel(x_ref, w14_ref, b1_ref, w2_ref, b2_ref,
                             w3_ref, b34_ref, o_ref):
    n, tho, wo, swc = x_ref.shape            # x block: (N, tho, Wo, sw*Cin) f32
    cin = w14_ref.shape[0]
    p1 = w2_ref.shape[0]
    p3 = w3_ref.shape[1]

    # Stride-sw column subsample: lanes [0:cin) of each sw*cin-wide row hold the
    # w % sw == 0 pixels.  Cast to bf16 in-kernel (no pre-cast HBM pass).
    x = x_ref[...].reshape(n * tho * wo, swc)[:, :cin].astype(jnp.bfloat16)

    # GEMM 1: conv1 ‖ conv4 share the LHS -> one MXU pass (N = p1 + p3).
    h14 = jnp.dot(x, w14_ref[...], preferred_element_type=jnp.float32)
    h1 = jnp.maximum(h14[:, :p1] + b1_ref[...], 0.0).astype(jnp.bfloat16)
    sc = h14[:, p1:]                          # conv4 shortcut (pre-bias, f32)

    # GEMM 2: dconv (Dconv_cos approximated as 1x1 conv) + bn2 + relu.
    h2 = jnp.dot(h1, w2_ref[...], preferred_element_type=jnp.float32)
    h2 = jnp.maximum(h2 + b2_ref[...], 0.0).astype(jnp.bfloat16)

    # GEMM 3: conv3; epilogue folds bn3+bn4 biases (b34) + residual + relu.
    h3 = jnp.dot(h2, w3_ref[...], preferred_element_type=jnp.float32)
    out = jnp.maximum(h3 + sc + b34_ref[...], 0.0)

    o_ref[...] = out.reshape(n, tho, wo, p3).astype(o_ref.dtype)


# ----------------------------------------------------------------------------
# Grid policy: 1 step on 1-TC chips (v5e/v6e), 2 equal steps on 2-TC chips (v7x)
# ----------------------------------------------------------------------------
def _num_tensorcores():
    nc = 1
    try:
        info = pltpu.get_tpu_info()
        for attr in ("num_cores", "num_tensorcores", "tensorcores_per_chip",
                     "cores_per_chip"):
            v = getattr(info, attr, None)
            if isinstance(v, int) and v > 0:
                nc = v
                break
    except Exception:
        pass
    if nc == 1:
        try:
            v = getattr(jax.devices()[0], "num_cores", None)
            if isinstance(v, int) and v > 0:
                nc = v
        except Exception:
            pass
    return max(1, min(nc, 2))   # current chips have at most 2 TCs


# ----------------------------------------------------------------------------
# Forward (NHWC native: zero extra HBM passes over the activation)
# ----------------------------------------------------------------------------
def bottleneck_dconv_forward_nhwc(params, x_nhwc, strides=(2, 2),
                                  num_row_blocks=None):
    n, h, w, cin = x_nhwc.shape
    sh, sw = strides
    assert h % sh == 0 and w % sw == 0, "fused path requires H % sh == 0 and W % sw == 0"
    ho, wo = h // sh, w // sw
    p1 = params["w2"].shape[0]
    p3 = params["w3"].shape[1]

    # Metadata-only reshape (contiguous, no HBM copy).  The squeezed block dim
    # pinned to 0 picks the h % sh == 0 rows; the in-kernel prefix-lane slice
    # picks the w % sw == 0 columns.
    x5 = x_nhwc.reshape(n, ho, sh, wo, sw * cin)

    if num_row_blocks is None:
        num_row_blocks = _num_tensorcores()
    nblk = num_row_blocks if (num_row_blocks >= 1 and ho % num_row_blocks == 0) else 1
    tho = ho // nblk

    def full(arr):
        return pl.BlockSpec(arr.shape, lambda i, nd=arr.ndim: (0,) * nd)

    out = pl.pallas_call(
        _bottleneck_dconv_kernel,
        out_shape=jax.ShapeDtypeStruct((n, ho, wo, p3), jnp.bfloat16),
        grid_spec=pltpu.PrefetchScalarGridSpec(
            num_scalar_prefetch=0,
            grid=(nblk,),
            in_specs=[
                # x row-tile: (N, tho, [h%sh==0], Wo, sw*Cin)
                pl.BlockSpec((n, tho, None, wo, sw * cin),
                             lambda i: (0, i, 0, 0, 0)),
                full(params["w14"]), full(params["b1"]),
                full(params["w2"]), full(params["b2"]),
                full(params["w3"]), full(params["b34"]),
            ],
            out_specs=pl.BlockSpec((n, tho, wo, p3), lambda i: (0, i, 0, 0)),
        ),
        compiler_params=pltpu.CompilerParams(
            dimension_semantics=("parallel",)),
    )(x5, params["w14"], params["b1"], params["w2"], params["b2"],
      params["w3"], params["b34"])
    return out


# NCHW adapter (PyTorch layout); the single transpose is the only extra pass.
def bottleneck_dconv_forward(params, x_nchw, strides=(2, 2)):
    x_nhwc = jnp.transpose(x_nchw, (0, 2, 3, 1))
    out = bottleneck_dconv_forward_nhwc(params, x_nhwc, strides)
    return jnp.transpose(out, (0, 3, 1, 2))


# Pure-JAX reference (same bf16 inputs / f32 accumulation) for validation.
def reference_forward(params, x_nhwc, strides=(2, 2)):
    sh, sw = strides
    xs = x_nhwc[:, ::sh, ::sw, :]
    n, ho, wo, cin = xs.shape
    x2d = xs.reshape(-1, cin).astype(jnp.bfloat16)
    p1 = params["w2"].shape[0]

    h14 = jnp.dot(x2d, params["w14"], preferred_element_type=jnp.float32)
    h1 = jnp.maximum(h14[:, :p1] + params["b1"], 0.0).astype(jnp.bfloat16)
    sc = h14[:, p1:]
    h2 = jnp.dot(h1, params["w2"], preferred_element_type=jnp.float32)
    h2 = jnp.maximum(h2 + params["b2"], 0.0).astype(jnp.bfloat16)
    h3 = jnp.dot(h2, params["w3"], preferred_element_type=jnp.float32)
    out = jnp.maximum(h3 + sc + params["b34"], 0.0)
    return out.reshape(n, ho, wo, -1)


# ----------------------------------------------------------------------------
# Deterministic parameter init (PyTorch-style) with BN folding + GEMM merging
# ----------------------------------------------------------------------------
def _conv1x1_w(key, cin, cout):
    # kaiming_normal_(mode='fan_out', relu), k=1: std = sqrt(2 / cout)
    std = (2.0 / cout) ** 0.5
    return jax.random.normal(key, (cin, cout), jnp.float32) * std


def _bn_fold(cout):
    # gamma=1, beta=0, mean=0, var=1 -> scale = 1/sqrt(1+eps), bias = 0
    scale = jnp.full((cout,), 1.0 / jnp.sqrt(1.0 + BN_EPS), jnp.float32)
    bias = jnp.zeros((1, cout), jnp.float32)
    return scale, bias


def init_bottleneck_dconv(key, inplanes, planes, kernel_size=3):
    del kernel_size  # unused by the module's convs (conv1/3/4 are 1x1)
    p1, p2, p3 = planes
    k1, k2, k3, k4 = jax.random.split(key, 4)
    s1, b1 = _bn_fold(p1)
    s2, b2 = _bn_fold(p2)
    s3, b3 = _bn_fold(p3)
    s4, b4 = _bn_fold(p3)
    # Fold BN scales into weight columns; keep biases in f32.
    w1 = _conv1x1_w(k1, inplanes, p1) * s1[None, :]
    # TODO(synk): Dconv_cos definition unavailable; approximated as a 1x1 conv plane1->plane2.
    w2 = _conv1x1_w(k2, p1, p2) * s2[None, :]
    w3 = _conv1x1_w(k3, p2, p3) * s3[None, :]
    w4 = _conv1x1_w(k4, inplanes, p3) * s4[None, :]
    # conv1 ‖ conv4 N-concat (shared LHS); bn3/bn4 biases pre-added.
    w14 = jnp.concatenate([w1, w4], axis=1).astype(jnp.bfloat16)
    return {"w14": w14, "b1": b1,
            "w2": w2.astype(jnp.bfloat16), "b2": b2,
            "w3": w3.astype(jnp.bfloat16), "b34": b3 + b4}


# ----------------------------------------------------------------------------
if __name__ == "__main__":
    inplanes = 64
    planes = (16, 16, 64)
    strides = (2, 2)

    key = jax.random.PRNGKey(0)
    kp, kx = jax.random.split(key)
    params = init_bottleneck_dconv(kp, inplanes, planes, kernel_size=3)

    # NHWC input; 16x16 spatial -> 8x8 after stride 2 (matches the
    # Dconv_cos(8, 8, ...) declaration in the reference module).
    x_nhwc = jax.random.normal(kx, (2, 16, 16, inplanes), jnp.float32)

    fwd = jax.jit(functools.partial(bottleneck_dconv_forward_nhwc, strides=strides))
    out = jax.block_until_ready(fwd(params, x_nhwc))
    ref = jax.block_until_ready(reference_forward(params, x_nhwc, strides))

    assert out.shape == (2, 8, 8, planes[2]), out.shape
    assert out.dtype == jnp.bfloat16
    out_f32 = out.astype(jnp.float32)
    assert bool(jnp.all(jnp.isfinite(out_f32)))
    assert bool(jnp.allclose(out_f32, ref, rtol=2e-2, atol=2e-2))

    # NCHW adapter (PyTorch layout) parity check.
    x_nchw = jnp.transpose(x_nhwc, (0, 3, 1, 2))
    fwd_nchw = jax.jit(functools.partial(bottleneck_dconv_forward, strides=strides))
    out_nchw = jax.block_until_ready(fwd_nchw(params, x_nchw))
    assert out_nchw.shape == (2, planes[2], 8, 8), out_nchw.shape
    assert bool(jnp.allclose(out_nchw.astype(jnp.float32),
                             jnp.transpose(ref, (0, 3, 1, 2)),
                             rtol=2e-2, atol=2e-2))

    print("KERNEL_OK")
</pallas_src>

<mosaic_0001>
module attributes {stable_mosaic.version = 11 : i64} {
  func.func @_bottleneck_dconv_kernel(%arg0: i32, %arg1: memref<2x8x1x8x128xf32, #tpu.memory_space<vmem>>, %arg2: memref<64x80xbf16, #tpu.memory_space<vmem>>, %arg3: memref<1x16xf32, #tpu.memory_space<vmem>>, %arg4: memref<16x16xbf16, #tpu.memory_space<vmem>>, %arg5: memref<1x16xf32, #tpu.memory_space<vmem>>, %arg6: memref<16x64xbf16, #tpu.memory_space<vmem>>, %arg7: memref<1x64xf32, #tpu.memory_space<vmem>>, %arg8: memref<2x8x8x64xbf16, #tpu.memory_space<vmem>>) attributes {dimension_semantics = [#tpu.dimension_semantics<parallel>], iteration_bounds = array<i64: 1>, scalar_prefetch = 0 : i64, scratch_operands = 0 : i64, tpu.core_type = #tpu.core_type<tc>, window_params = [{transform_indices = @transform_0, window_bounds = array<i64: 2, 8, 1, 8, 128>}, {pipeline_mode = #tpu.pipeline_mode<synchronous>, transform_indices = @transform_1, window_bounds = array<i64: 64, 80>}, {pipeline_mode = #tpu.pipeline_mode<synchronous>, transform_indices = @transform_2, window_bounds = array<i64: 1, 16>}, {pipeline_mode = #tpu.pipeline_mode<synchronous>, transform_indices = @transform_3, window_bounds = array<i64: 16, 16>}, {pipeline_mode = #tpu.pipeline_mode<synchronous>, transform_indices = @transform_4, window_bounds = array<i64: 1, 16>}, {pipeline_mode = #tpu.pipeline_mode<synchronous>, transform_indices = @transform_5, window_bounds = array<i64: 16, 64>}, {pipeline_mode = #tpu.pipeline_mode<synchronous>, transform_indices = @transform_6, window_bounds = array<i64: 1, 64>}, {transform_indices = @transform_7, window_bounds = array<i64: 2, 8, 8, 64>}]} {
    %c0 = arith.constant 0 : index
    %c0_0 = arith.constant 0 : index
    %c0_1 = arith.constant 0 : index
    %c0_2 = arith.constant 0 : index
    %c0_3 = arith.constant 0 : index
    %0 = vector.load %arg1[%c0, %c0_0, %c0_1, %c0_2, %c0_3] : memref<2x8x1x8x128xf32, #tpu.memory_space<vmem>>, vector<2x8x1x8x128xf32>
    %1 = vector.shape_cast %0 : vector<2x8x1x8x128xf32> to vector<2x8x8x128xf32>
    %2 = vector.shape_cast %1 : vector<2x8x8x128xf32> to vector<128x128xf32>
    %3 = vector.extract_strided_slice %2 {offsets = [0, 0], sizes = [128, 64], strides = [1, 1]} : vector<128x128xf32> to vector<128x64xf32>
    %4 = arith.truncf %3 : vector<128x64xf32> to vector<128x64xbf16>
    %c0_4 = arith.constant 0 : index
    %c0_5 = arith.constant 0 : index
    %5 = vector.load %arg2[%c0_4, %c0_5] : memref<64x80xbf16, #tpu.memory_space<vmem>>, vector<64x80xbf16>
    %cst = arith.constant dense<0.000000e+00> : vector<128x80xf32>
    %6 = tpu.matmul %4, %5, %cst {dimension_numbers = #tpu.dot_dimension_numbers<[1], [0], [0], [1], [0, 0, 1, 1], [], []>} : vector<128x64xbf16>, vector<64x80xbf16>, vector<128x80xf32> -> vector<128x80xf32>
    %7 = vector.extract_strided_slice %6 {offsets = [0, 0], sizes = [128, 16], strides = [1, 1]} : vector<128x80xf32> to vector<128x16xf32>
    %c0_6 = arith.constant 0 : index
    %c0_7 = arith.constant 0 : index
    %8 = vector.load %arg3[%c0_6, %c0_7] : memref<1x16xf32, #tpu.memory_space<vmem>>, vector<1x16xf32>
    %9 = vector.broadcast %8 : vector<1x16xf32> to vector<128x16xf32>
    %10 = arith.addf %7, %9 : vector<128x16xf32>
    %cst_8 = arith.constant 0.000000e+00 : f32
    %11 = vector.broadcast %cst_8 : f32 to vector<128x16xf32>
    %12 = arith.maximumf %10, %11 : vector<128x16xf32>
    %13 = arith.truncf %12 : vector<128x16xf32> to vector<128x16xbf16>
    %14 = vector.extract_strided_slice %6 {offsets = [0, 16], sizes = [128, 64], strides = [1, 1]} : vector<128x80xf32> to vector<128x64xf32>
    %c0_9 = arith.constant 0 : index
    %c0_10 = arith.constant 0 : index
    %15 = vector.load %arg4[%c0_9, %c0_10] : memref<16x16xbf16, #tpu.memory_space<vmem>>, vector<16x16xbf16>
    %cst_11 = arith.constant dense<0.000000e+00> : vector<128x16xf32>
    %16 = tpu.matmul %13, %15, %cst_11 {dimension_numbers = #tpu.dot_dimension_numbers<[1], [0], [0], [1], [0, 0, 1, 1], [], []>} : vector<128x16xbf16>, vector<16x16xbf16>, vector<128x16xf32> -> vector<128x16xf32>
    %c0_12 = arith.constant 0 : index
    %c0_13 = arith.constant 0 : index
    %17 = vector.load %arg5[%c0_12, %c0_13] : memref<1x16xf32, #tpu.memory_space<vmem>>, vector<1x16xf32>
    %18 = vector.broadcast %17 : vector<1x16xf32> to vector<128x16xf32>
    %19 = arith.addf %16, %18 : vector<128x16xf32>
    %cst_14 = arith.constant 0.000000e+00 : f32
    %20 = vector.broadcast %cst_14 : f32 to vector<128x16xf32>
    %21 = arith.maximumf %19, %20 : vector<128x16xf32>
    %22 = arith.truncf %21 : vector<128x16xf32> to vector<128x16xbf16>
    %c0_15 = arith.constant 0 : index
    %c0_16 = arith.constant 0 : index
    %23 = vector.load %arg6[%c0_15, %c0_16] : memref<16x64xbf16, #tpu.memory_space<vmem>>, vector<16x64xbf16>
    %cst_17 = arith.constant dense<0.000000e+00> : vector<128x64xf32>
    %24 = tpu.matmul %22, %23, %cst_17 {dimension_numbers = #tpu.dot_dimension_numbers<[1], [0], [0], [1], [0, 0, 1, 1], [], []>} : vector<128x16xbf16>, vector<16x64xbf16>, vector<128x64xf32> -> vector<128x64xf32>
    %25 = arith.addf %24, %14 : vector<128x64xf32>
    %c0_18 = arith.constant 0 : index
    %c0_19 = arith.constant 0 : index
    %26 = vector.load %arg7[%c0_18, %c0_19] : memref<1x64xf32, #tpu.memory_space<vmem>>, vector<1x64xf32>
    %27 = vector.broadcast %26 : vector<1x64xf32> to vector<128x64xf32>
    %28 = arith.addf %25, %27 : vector<128x64xf32>
    %cst_20 = arith.constant 0.000000e+00 : f32
    %29 = vector.broadcast %cst_20 : f32 to vector<128x64xf32>
    %30 = arith.maximumf %28, %29 : vector<128x64xf32>
    %31 = vector.shape_cast %30 : vector<128x64xf32> to vector<2x8x8x64xf32>
    %32 = arith.truncf %31 : vector<2x8x8x64xf32> to vector<2x8x8x64xbf16>
    %c0_21 = arith.constant 0 : index
    %c0_22 = arith.constant 0 : index
    %c0_23 = arith.constant 0 : index
    %c0_24 = arith.constant 0 : index
    %33 = vector.load %arg8[%c0_21, %c0_22, %c0_23, %c0_24] : memref<2x8x8x64xbf16, #tpu.memory_space<vmem>>, vector<2x8x8x64xbf16>
    tpu.vector_store %arg8[%c0_21, %c0_22, %c0_23, %c0_24], %32 {strides = array<i32>} : memref<2x8x8x64xbf16, #tpu.memory_space<vmem>>, vector<2x8x8x64xbf16>,
    return
  }
  func.func @transform_0(%arg0: i32) -> (i32, i32, i32, i32, i32) {
    %c0_i32 = arith.constant 0 : i32
    %c0_i32_0 = arith.constant 0 : i32
    %c0_i32_1 = arith.constant 0 : i32
    %c0_i32_2 = arith.constant 0 : i32
    %c0_i32_3 = arith.constant 0 : i32
    return %c0_i32, %arg0, %c0_i32_0, %c0_i32_1, %c0_i32_2 : i32, i32, i32, i32, i32
  }
  func.func @transform_1(%arg0: i32) -> (i32, i32) {
    %c0_i32 = arith.constant 0 : i32
    %c0_i32_0 = arith.constant 0 : i32
    %c0_i32_1 = arith.constant 0 : i32
    return %c0_i32, %c0_i32_0 : i32, i32
  }
  func.func @transform_2(%arg0: i32) -> (i32, i32) {
    %c0_i32 = arith.constant 0 : i32
    %c0_i32_0 = arith.constant 0 : i32
    %c0_i32_1 = arith.constant 0 : i32
    return %c0_i32, %c0_i32_0 : i32, i32
  }
  func.func @transform_3(%arg0: i32) -> (i32, i32) {
    %c0_i32 = arith.constant 0 : i32
    %c0_i32_0 = arith.constant 0 : i32
    %c0_i32_1 = arith.constant 0 : i32
    return %c0_i32, %c0_i32_0 : i32, i32
  }
  func.func @transform_4(%arg0: i32) -> (i32, i32) {
    %c0_i32 = arith.constant 0 : i32
    %c0_i32_0 = arith.constant 0 : i32
    %c0_i32_1 = arith.constant 0 : i32
    return %c0_i32, %c0_i32_0 : i32, i32
  }
  func.func @transform_5(%arg0: i32) -> (i32, i32) {
    %c0_i32 = arith.constant 0 : i32
    %c0_i32_0 = arith.constant 0 : i32
    %c0_i32_1 = arith.constant 0 : i32
    return %c0_i32, %c0_i32_0 : i32, i32
  }
  func.func @transform_6(%arg0: i32) -> (i32, i32) {
    %c0_i32 = arith.constant 0 : i32
    %c0_i32_0 = arith.constant 0 : i32
    %c0_i32_1 = arith.constant 0 : i32
    return %c0_i32, %c0_i32_0 : i32, i32
  }
  func.func @transform_7(%arg0: i32) -> (i32, i32, i32, i32) {
    %c0_i32 = arith.constant 0 : i32
    %c0_i32_0 = arith.constant 0 : i32
    %c0_i32_1 = arith.constant 0 : i32
    %c0_i32_2 = arith.constant 0 : i32
    return %c0_i32, %arg0, %c0_i32_0, %c0_i32_1 : i32, i32, i32, i32
  }
}

</mosaic_0001>

<bundles_post_ra>
// kernel: bottleneck_dconv_forward_nhwc.1
= control target key start
LH: loop header
LB: loop body
LE: loop exit
PB: predicated region body
PF: predicated region fallthrough
CT: control target
= control target key end

     0   :  { %vm178_vm0 = vcmask 523264   ;;  %s1175_s0 = inlined_call_operand.vmem [shape: f32[2,8,2,8,128], index: 0, kind: input, shape index: {}]   ;;  %s1176_s1 = inlined_call_operand.vmem [shape: bf16[64,80], index: 1, kind: input, shape index: {}]   ;;  %s1177_s2 = inlined_call_operand.vmem [shape: f32[1,16], index: 2, kind: input, shape index: {}]   ;;  %s1178_s3 = inlined_call_operand.vmem [shape: bf16[16,16], index: 3, kind: input, shape index: {}]   ;;  %s1179_s4 = inlined_call_operand.vmem [shape: f32[1,16], index: 4, kind: input, shape index: {}]   ;;  %s1180_s5 = inlined_call_operand.vmem [shape: bf16[16,64], index: 5, kind: input, shape index: {}]   ;;  %s1181_s6 = inlined_call_operand.vmem [shape: f32[1,64], index: 6, kind: input, shape index: {}]   ;;  %s1182_s7 = inlined_call_operand.hbm [shape: bf16[2,8,8,64], index: 7, kind: output, shape index: {}]  }
   0x1   :  { %v922_v0 = vld [vmem:[%s1176_s1] sm:$0xff]   ;;  %v923_v1 = vld [vmem:[%s1176_s1 + $0x8] sm:$0xff]   ;;  %v924_v2 = vld [vmem:[%s1176_s1 + $0x10] sm:$0xff]  }
   0x2   :  { %856 = vmatprep.subr.bf16.mxu0 %v922_v0  ;;  %v72_v3 = vld [vmem:[%s1175_s0] sm:$0xff]  ;;  %v74_v4 = vld [vmem:[%s1175_s0 + $0x10] sm:$0xff]  ;;  %v925_v6 = vld [vmem:[%s1176_s1 + $0x18] sm:$0xff]  }
   0x3   :  { %857 = vmatpush3.bf16.msra.mxu0 %v922_v0  ;;  %v138_v5 = vpack.c.bf16 %v74_v4, %v72_v3  ;;  %v926_v7 = vld [vmem:[%s1178_s3] sm:$0xff]   ;;  %v78_v9 = vld [vmem:[%s1175_s0 + $0x30] sm:$0xff] }
   0x4   :  { %858 = vmatprep.subr.bf16.mxu0 %v923_v1  ;;  %v76_v8 = vld [vmem:[%s1175_s0 + $0x20] sm:$0xff] }
   0x5   :  { %864 = vmatprep.mubr.msk.bf16.mxu0 %vm178_vm0, %v138_v5 }
   0x7   :  { %859 = vmatpush3.bf16.msra.mxu0 %v923_v1 }
   0x8   :  { %860 = vmatprep.subr.bf16.mxu0 %v924_v2 }
   0xb   :  { %861 = vmatpush3.bf16.msra.mxu0 %v924_v2 }
   0xc   :  { %12 = vsyncpa [#allocation4], 0  ;;  %862 = vmatprep.subr.bf16.mxu0 %v925_v6  ;;  %v80_v10 = vld [vmem:[%s1175_s0 + $0x40] sm:$0xff]  ;;  %v82_v11 = vld [vmem:[%s1175_s0 + $0x50] sm:$0xff]  ;;  %916 = vmatprep.subr.bf16.mxu1 %v926_v7  ;;  %v139_v12 = vpack.c.bf16 %v78_v9, %v76_v8  ;;  %s952_s20 = smov 112   ;;  %vm362_vm1 = vcmask 130048  }
   0xd   :  { %917 = vmatpush3.bf16.msra.mxu1 %v926_v7  ;;  %v140_v13 = vpack.c.bf16 %v82_v11, %v80_v10  ;;  %v84_v14 = vld [vmem:[%s1175_s0 + $0x60] sm:$0xff]  ;;  %v86_v15 = vld [vmem:[%s1175_s0 + $0x70] sm:$0xff]  ;;  %vm756_vm2 = vcmask 519168  }
   0xe   :  { %v88_v16 = vld [vmem:[%s1175_s0 + $0x80] sm:$0xff]  ;;  %v90_v17 = vld [vmem:[%s1175_s0 + $0x90] sm:$0xff]  ;;  %v141_v18 = vpack.c.bf16 %v86_v15, %v84_v14 }
   0xf   :  { %863 = vmatpush3.bf16.msra.mxu0 %v925_v6  ;;  %v142_v19 = vpack.c.bf16 %v90_v17, %v88_v16  ;;  %v92_v20 = vld [vmem:[%s1175_s0 + $0xa0] sm:$0xff]  ;;  %v94_v21 = vld [vmem:[%s1175_s0 + $0xb0] sm:$0xff] }
  0x10   :  { %880 = vmatprep.subr.bf16.mxu0 %v926_v7  ;;  %v96_v22 = vld [vmem:[%s1175_s0 + $0xc0] sm:$0xff]  ;;  %v98_v23 = vld [vmem:[%s1175_s0 + $0xd0] sm:$0xff]  ;;  %v143_v24 = vpack.c.bf16 %v94_v21, %v92_v20 }
  0x11   :  { %v144_v25 = vpack.c.bf16 %v98_v23, %v96_v22  ;;  %v100_v26 = vld [vmem:[%s1175_s0 + $0xe0] sm:$0xff]  ;;  %v102_v27 = vld [vmem:[%s1175_s0 + $0xf0] sm:$0xff] }
  0x12   :  { %865 = vmatmul.mubr.msk.bf16.vlgmr.msra.gmra.mrb[0].mxu0 %vm178_vm0, %v139_v12  ;;  %v145_v28 = vpack.c.bf16 %v102_v27, %v100_v26  ;;  %v1070_v29 = vld [vmem:[%s1177_s2] ss:$0 sm:$0xff] }
  0x13   :  { %868 = vmatprep.mubr.msk.bf16.mxu0 %vm178_vm0, %v140_v13  ;;  %881 = vmatpush3.bf16.msra.mxu0 %v926_v7  ;;  %v927_v63 = vld [vmem:[%s1180_s5] sm:$0xff]  }
  0x14   :  { %898 = vmatprep.subr.bf16.mxu1 %v927_v63  ;;  %v806_v23 = vld [vmem:[%s1179_s4] ss:$0 sm:$0xff] }
  0x1a   :  { %869 = vmatmul.mubr.msk.bf16.gmra.mrb[4].mxu0 %vm178_vm0, %v141_v18 }
  0x1b   :  { %872 = vmatprep.mubr.msk.bf16.mxu0 %vm178_vm0, %v142_v19 }
  0x22   :  { %873 = vmatmul.mubr.msk.bf16.gmra.mrb[8].mxu0 %vm178_vm0, %v143_v24 }
  0x23   :  { %876 = vmatprep.mubr.msk.bf16.mxu0 %vm178_vm0, %v144_v25 }
  0x2a   :  { %877 = vmatmul.mubr.msk.bf16.gmra.mrb[12].mxu0 %vm178_vm0, %v145_v28 }
  0xe5   :  { %v866_v30 = vpop.f32.mrb[0].mxu0 }
  0xe6   :  { %v309_v31 = vadd.f32 %v866_v30, %v1070_v29  ;;  %536 = vrot.lane.b32.xlu1 %v866_v30, %s952_s20  ;;  %v237_v32 = vpop.f32.mrb[1].mxu0 }
  0xe7   :  { %v307_v33 = vadd.f32 %v1070_v29, %v237_v32  ;;  %532 = vrot.lane.b32.xlu0 %v237_v32, %s952_s20  ;;  %v867_v34 = vpop.f32.mrb[2].mxu0 }
  0xe8   :  { %v310_v35 = vadd.f32 %v867_v34, %v1070_v29  ;;  %v240_v36 = vpop.f32.mrb[3].mxu0  ;;  %v325_v38 = vmax.f32 %v309_v31, 0.0 }
  0xe9   :  { %v308_v37 = vadd.f32 %v1070_v29, %v240_v36  ;;  %v323_v40 = vmax.f32 %v307_v33, 0.0 }
  0xea   :  { %v326_v39 = vmax.f32 %v310_v35, 0.0  ;;  %538 = vrot.lane.b32.xlu1 %v867_v34, %s952_s20 }
  0xeb   :  { %v324_v41 = vmax.f32 %v308_v37, 0.0  ;;  %534 = vrot.lane.b32.xlu0 %v240_v36, %s952_s20 }
  0xec   :  { %v340_v42 = vpack.c.bf16 %v326_v39, %v325_v38 }
  0xed   :  { %v339_v43 = vpack.c.bf16 %v324_v41, %v323_v40  ;;  %v870_v44 = vpop.f32.mrb[4].mxu0 }
  0xee   :  { %v313_v45 = vadd.f32 %v870_v44, %v1070_v29  ;;  %v253_v46 = vpop.f32.mrb[5].mxu0 }
  0xef   :  { %v311_v47 = vadd.f32 %v1070_v29, %v253_v46  ;;  %882 = vmatprep.mubr.msk.bf16.mxu0 %vm362_vm1, %v339_v43  ;;  %544 = vrot.lane.b32.xlu0 %v870_v44, %s952_s20  ;;  %v871_v48 = vpop.f32.mrb[6].mxu0 }
  0xf0   :  { %v314_v49 = vadd.f32 %v871_v48, %v1070_v29  ;;  %883 = vmatmul.mubr.msk.bf16.vlgmr.msra.gmra.mrb[16].mxu0 %vm362_vm1, %v340_v42  ;;  %546 = vrot.lane.b32.xlu1 %v871_v48, %s952_s20  ;;  %v256_v50 = vpop.f32.mrb[7].mxu0  ;;  %v329_v52 = vmax.f32 %v313_v45, 0.0 }
  0xf1   :  { %v312_v51 = vadd.f32 %v1070_v29, %v256_v50  ;;  %v327_v54 = vmax.f32 %v311_v47, 0.0 }
  0xf2   :  { %v330_v53 = vmax.f32 %v314_v49, 0.0 }
  0xf3   :  { %v328_v55 = vmax.f32 %v312_v51, 0.0  ;;  %540 = vrot.lane.b32.xlu0 %v253_v46, %s952_s20 }
  0xf4   :  { %v342_v56 = vpack.c.bf16 %v330_v53, %v329_v52  ;;  %542 = vrot.lane.b32.xlu1 %v256_v50, %s952_s20 }
  0xf5   :  { %v874_v57 = vpop.f32.mrb[8].mxu0  ;;  %v341_v58 = vpack.c.bf16 %v328_v55, %v327_v54 }
  0xf6   :  { %v317_v59 = vadd.f32 %v874_v57, %v1070_v29  ;;  %v269_v60 = vpop.f32.mrb[9].mxu0 }
  0xf7   :  { %v315_v61 = vadd.f32 %v1070_v29, %v269_v60  ;;  %886 = vmatprep.mubr.msk.bf16.mxu1 %vm362_vm1, %v341_v58  ;;  %552 = vrot.lane.b32.xlu0 %v874_v57, %s952_s20  ;;  %v875_v62 = vpop.f32.mrb[10].mxu0 }
  0xf8   :  { %v318_v0 = vadd.f32 %v875_v62, %v1070_v29  ;;  %887 = vmatmul.mubr.msk.bf16.vlgmr.msra.gmra.mrb[0].mxu1 %vm362_vm1, %v342_v56  ;;  %554 = vrot.lane.b32.xlu1 %v875_v62, %s952_s20  ;;  %v272_v1 = vpop.f32.mrb[11].mxu0  ;;  %v333_v3 = vmax.f32 %v317_v59, 0.0 }
  0xf9   :  { %v316_v2 = vadd.f32 %v1070_v29, %v272_v1  ;;  %899 = vmatpush3.bf16.msra.mxu1 %v927_v63  ;;  %v331_v5 = vmax.f32 %v315_v61, 0.0 }
  0xfa   :  { %v334_v4 = vmax.f32 %v318_v0, 0.0 }
  0xfb   :  { %v332_v6 = vmax.f32 %v316_v2, 0.0  ;;  %548 = vrot.lane.b32.xlu0 %v269_v60, %s952_s20 }
  0xfc   :  { %v344_v7 = vpack.c.bf16 %v334_v4, %v333_v3  ;;  %550 = vrot.lane.b32.xlu1 %v272_v1, %s952_s20 }
  0xfd   :  { %v343_v8 = vpack.c.bf16 %v332_v6, %v331_v5  ;;  %v878_v9 = vpop.f32.mrb[12].mxu0 }
  0xfe   :  { %v321_v10 = vadd.f32 %v878_v9, %v1070_v29  ;;  %v285_v11 = vpop.f32.mrb[13].mxu0 }
  0xff   :  { %v319_v12 = vadd.f32 %v1070_v29, %v285_v11  ;;  %890 = vmatprep.mubr.msk.bf16.mxu1 %vm362_vm1, %v343_v8  ;;  %556 = vrot.lane.b32.xlu0 %v285_v11, %s952_s20  ;;  %v879_v13 = vpop.f32.mrb[14].mxu0 }
 0x100   :  { %v322_v14 = vadd.f32 %v879_v13, %v1070_v29  ;;  %v288_v15 = vpop.f32.mrb[15].mxu0  ;;  %891 = vmatmul.mubr.msk.bf16.gmra.mrb[4].mxu1 %vm362_vm1, %v344_v7  ;;  %v337_v17 = vmax.f32 %v321_v10, 0.0 }
 0x101   :  { %v320_v16 = vadd.f32 %v1070_v29, %v288_v15  ;;  %558 = vrot.lane.b32.xlu1 %v288_v15, %s952_s20  ;;  %v335_v19 = vmax.f32 %v319_v12, 0.0 }
 0x102   :  { %v338_v18 = vmax.f32 %v322_v14, 0.0 }
 0x103   :  { %v336_v20 = vmax.f32 %v320_v16, 0.0  ;;  %560 = vrot.lane.b32.xlu0 %v878_v9, %s952_s20 }
 0x104   :  { %v346_v21 = vpack.c.bf16 %v338_v18, %v337_v17 }
 0x105   :  { %v345_v22 = vpack.c.bf16 %v336_v20, %v335_v19  ;;  %562 = vrot.lane.b32.xlu1 %v879_v13, %s952_s20 }
 0x107   :  { %894 = vmatprep.mubr.msk.bf16.mxu1 %vm362_vm1, %v345_v22 }
 0x108   :  { %895 = vmatmul.mubr.msk.bf16.gmra.mrb[8].mxu1 %vm362_vm1, %v346_v21 }
 0x158   :  { %v537_v17 = vpop.permute.xlu1 %536 }
 0x159   :  { %v533_v16 = vpop.permute.xlu0 %532 }
 0x15c   :  { %v539_v19 = vpop.permute.xlu1 %538 }
 0x15d   :  { %v535_v18 = vpop.permute.xlu0 %534 }
 0x161   :  { %v545_v20 = vpop.permute.xlu0 %544 }
 0x162   :  { %v547_v21 = vpop.permute.xlu1 %546 }
 0x165   :  { %v541_v22 = vpop.permute.xlu0 %540 }
 0x1c3   :  { %v884_v24 = vpop.f32.mrb[16].mxu0 }
 0x1c4   :  { %v430_v25 = vadd.f32 %v884_v24, %v806_v23  ;;  %v421_v26 = vpop.f32.mrb[17].mxu0 }
 0x1c5   :  { %v422_v27 = vadd.f32 %v806_v23, %v421_v26  ;;  %v885_v28 = vpop.f32.mrb[18].mxu0 }
 0x1c6   :  { %v433_v29 = vadd.f32 %v885_v28, %v806_v23  ;;  %v424_v30 = vpop.f32.mrb[19].mxu0  ;;  %v486_v32 = vmax.f32 %v430_v25, 0.0 }
 0x1c7   :  { %v425_v31 = vadd.f32 %v806_v23, %v424_v30  ;;  %v484_v34 = vmax.f32 %v422_v27, 0.0  ;;  %v543_v27 = vpop.permute.xlu1 %542 }
 0x1c8   :  { %v487_v33 = vmax.f32 %v433_v29, 0.0 }
 0x1c9   :  { %v485_v35 = vmax.f32 %v425_v31, 0.0 }
 0x1ca   :  { %v501_v36 = vpack.c.bf16 %v487_v33, %v486_v32 }
 0x1cb   :  { %v500_v37 = vpack.c.bf16 %v485_v35, %v484_v34  ;;  %v888_v38 = vpop.f32.mrb[0].mxu1 }
 0x1cc   :  { %v446_v39 = vadd.f32 %v888_v38, %v806_v23  ;;  %v437_v40 = vpop.f32.mrb[1].mxu1 }
 0x1cd   :  { %v438_v41 = vadd.f32 %v806_v23, %v437_v40  ;;  %v889_v42 = vpop.f32.mrb[2].mxu1  ;;  %900 = vmatprep.mubr.msk.bf16.mxu1 %vm362_vm1, %v500_v37  ;;  %v553_v37 = vpop.permute.xlu0 %552 }
 0x1ce   :  { %v449_v43 = vadd.f32 %v889_v42, %v806_v23  ;;  %v440_v44 = vpop.f32.mrb[3].mxu1  ;;  %901 = vmatmul.mubr.msk.bf16.vlgmr.msra.gmra.mrb[12].mxu1 %vm362_vm1, %v501_v36  ;;  %v490_v46 = vmax.f32 %v446_v39, 0.0  ;;  %v555_v42 = vpop.permute.xlu1 %554 }
 0x1cf   :  { %v441_v45 = vadd.f32 %v806_v23, %v440_v44  ;;  %v488_v48 = vmax.f32 %v438_v41, 0.0 }
 0x1d0   :  { %v491_v47 = vmax.f32 %v449_v43, 0.0 }
 0x1d1   :  { %v489_v49 = vmax.f32 %v441_v45, 0.0 }
 0x1d2   :  { %v503_v50 = vpack.c.bf16 %v491_v47, %v490_v46 }
 0x1d3   :  { %v502_v51 = vpack.c.bf16 %v489_v49, %v488_v48  ;;  %v892_v52 = vpop.f32.mrb[4].mxu1 }
 0x1d4   :  { %v462_v53 = vadd.f32 %v892_v52, %v806_v23  ;;  %v453_v54 = vpop.f32.mrb[5].mxu1 }
 0x1d5   :  { %v454_v55 = vadd.f32 %v806_v23, %v453_v54  ;;  %v893_v56 = vpop.f32.mrb[6].mxu1  ;;  %904 = vmatprep.mubr.msk.bf16.mxu1 %vm362_vm1, %v502_v51 }
 0x1d6   :  { %v465_v57 = vadd.f32 %v893_v56, %v806_v23  ;;  %v456_v58 = vpop.f32.mrb[7].mxu1  ;;  %905 = vmatmul.mubr.msk.bf16.gmra.mrb[16].mxu1 %vm362_vm1, %v503_v50  ;;  %v494_v60 = vmax.f32 %v462_v53, 0.0 }
 0x1d7   :  { %v457_v59 = vadd.f32 %v806_v23, %v456_v58  ;;  %v492_v62 = vmax.f32 %v454_v55, 0.0  ;;  %v549_v55 = vpop.permute.xlu0 %548 }
 0x1d8   :  { %v495_v61 = vmax.f32 %v465_v57, 0.0 }
 0x1d9   :  { %v493_v63 = vmax.f32 %v457_v59, 0.0 }
 0x1da   :  { %v505_v0 = vpack.c.bf16 %v495_v61, %v494_v60  ;;  %v551_v60 = vpop.permute.xlu1 %550 }
 0x1db   :  { %v504_v1 = vpack.c.bf16 %v493_v63, %v492_v62  ;;  %v896_v2 = vpop.f32.mrb[8].mxu1 }
 0x1dc   :  { %v478_v3 = vadd.f32 %v896_v2, %v806_v23  ;;  %v469_v4 = vpop.f32.mrb[9].mxu1 }
 0x1dd   :  { %v470_v5 = vadd.f32 %v806_v23, %v469_v4  ;;  %v897_v6 = vpop.f32.mrb[10].mxu1  ;;  %908 = vmatprep.mubr.msk.bf16.mxu1 %vm362_vm1, %v504_v1 }
 0x1de   :  { %v481_v7 = vadd.f32 %v897_v6, %v806_v23  ;;  %v472_v8 = vpop.f32.mrb[11].mxu1  ;;  %909 = vmatmul.mubr.msk.bf16.gmra.mrb[20].mxu1 %vm362_vm1, %v505_v0  ;;  %v498_v10 = vmax.f32 %v478_v3, 0.0 }
 0x1df   :  { %v473_v9 = vadd.f32 %v806_v23, %v472_v8  ;;  %v496_v12 = vmax.f32 %v470_v5, 0.0  ;;  %v1129_v23 = vld [vmem:[%s1181_s6] ss:$0 sm:$0xff]  ;;  %s953_s6 = smov [#allocation3]  }
 0x1e0   :  { %v499_v11 = vmax.f32 %v481_v7, 0.0  ;;  %v557_v7 = vpop.permute.xlu0 %556  ;;  %s778_s3 = sshll.u32 %s953_s6, 4  ;;  %s779_s3 = int_to_ptr.vmem [resolvable:$true] %s778_s3 }
 0x1e1   :  { %v497_v13 = vmax.f32 %v473_v9, 0.0  ;;  %s928_s22 = scalar_lea.vmem %s779_s3, 1024  ;;  %p933_p1 = scmp.lt.s32.totalorder %s779_s3, %s779_s3 }
 0x1e2   :  { %v507_v14 = vpack.c.bf16 %v499_v11, %v498_v10  ;;  %p929_p0 = scmp.ne.s32.totalorder %s779_s3, %s928_s22  ;;  %p934_p2 = scmp.lt.s32.totalorder %s928_s22, %s928_s22 }
 0x1e3   :  { %v506_v15 = vpack.c.bf16 %v497_v13, %v496_v12 }
 0x1e4   :  { %p935_p3 = por %p934_p2, %p933_p1 }
 0x1e5   :  { %912 = vmatprep.mubr.msk.bf16.mxu1 %vm362_vm1, %v506_v15 }
 0x1e6   :  { %913 = vmatmul.mubr.msk.bf16.gmra.mrb[24].mxu1 %vm362_vm1, %v507_v14  ;;  %v559_v14 = vpop.permute.xlu1 %558  ;;  %p936_p4 = pnand %p935_p3, %p929_p0 }
 0x2a1   :  { %v902_v24 = vpop.f32.mrb[12].mxu1 }
 0x2a2   :  { %v647_v25 = vadd.f32 %v902_v24, %v537_v17  ;;  %v638_v26 = vpop.f32.mrb[13].mxu1  ;;  %v561_v24 = vpop.permute.xlu0 %560 }
 0x2a3   :  { %v639_v28 = vadd.f32 %v638_v26, %v533_v16  ;;  %v903_v29 = vpop.f32.mrb[14].mxu1 }
 0x2a4   :  { %v710_v30 = vadd.f32 %v1129_v23, %v647_v25  ;;  %v650_v31 = vadd.f32 %v903_v29, %v539_v19  ;;  %v641_v32 = vpop.f32.mrb[15].mxu1 }
 0x2a5   :  { %v708_v33 = vadd.f32 %v1129_v23, %v639_v28  ;;  %v642_v34 = vadd.f32 %v641_v32, %v535_v18 }
 0x2a6   :  { %v726_v35 = vmax.f32 %v710_v30, 0.0  ;;  %v711_v36 = vadd.f32 %v1129_v23, %v650_v31  ;;  %v563_v31 = vpop.permute.xlu1 %562 }
 0x2a7   :  { %v724_v38 = vmax.f32 %v708_v33, 0.0  ;;  %v709_v39 = vadd.f32 %v1129_v23, %v642_v34 }
 0x2a8   :  { %v742_v40 = vpack.c.bf16 %v726_v35, %v726_v35  ;;  %v727_v41 = vmax.f32 %v711_v36, 0.0 }
 0x2a9   :  { %v740_v43 = vpack.c.bf16 %v724_v38, %v724_v38  ;;  %v725_v44 = vmax.f32 %v709_v39, 0.0  ;;  %v906_v45 = vpop.f32.mrb[16].mxu1 }
 0x2aa   :  { %759 = vst.msk [vmem:[#allocation3 + $0x8] sm:$0xf] %vm756_vm2, %v742_v40  ;;  %v743_v46 = vpack.c.bf16 %v727_v41, %v727_v41  ;;  %v663_v47 = vadd.f32 %v906_v45, %v545_v20  ;;  %v654_v48 = vpop.f32.mrb[17].mxu1 }
 0x2ab   :  { %757 = vst.msk [vmem:[#allocation3] sm:$0xf] %vm756_vm2, %v740_v43  ;;  %v741_v49 = vpack.c.bf16 %v725_v44, %v725_v44  ;;  %v655_v50 = vadd.f32 %v654_v48, %v541_v22  ;;  %v907_v51 = vpop.f32.mrb[18].mxu1 }
 0x2ac   :  { %760 = vst.msk [vmem:[#allocation3 + $0xc] sm:$0xf] %vm756_vm2, %v743_v46  ;;  %v714_v52 = vadd.f32 %v1129_v23, %v663_v47  ;;  %v666_v53 = vadd.f32 %v907_v51, %v547_v21  ;;  %v657_v54 = vpop.f32.mrb[19].mxu1 }
 0x2ad   :  { %758 = vst.msk [vmem:[#allocation3 + $0x4] sm:$0xf] %vm756_vm2, %v741_v49  ;;  %v712_v56 = vadd.f32 %v1129_v23, %v655_v50  ;;  %v658_v57 = vadd.f32 %v657_v54, %v543_v27 }
 0x2ae   :  { %v730_v58 = vmax.f32 %v714_v52, 0.0  ;;  %v715_v59 = vadd.f32 %v1129_v23, %v666_v53 }
 0x2af   :  { %v728_v61 = vmax.f32 %v712_v56, 0.0  ;;  %v713_v62 = vadd.f32 %v1129_v23, %v658_v57 }
 0x2b0   :  { %v746_v63 = vpack.c.bf16 %v730_v58, %v730_v58  ;;  %v731_v0 = vmax.f32 %v715_v59, 0.0 }
 0x2b1   :  { %v744_v1 = vpack.c.bf16 %v728_v61, %v728_v61  ;;  %v729_v2 = vmax.f32 %v713_v62, 0.0  ;;  %v910_v3 = vpop.f32.mrb[20].mxu1 }
 0x2b2   :  { %763 = vst.msk [vmem:[#allocation3 + $0x18] sm:$0xf] %vm756_vm2, %v746_v63  ;;  %v747_v4 = vpack.c.bf16 %v731_v0, %v731_v0  ;;  %v679_v5 = vadd.f32 %v910_v3, %v553_v37  ;;  %v670_v6 = vpop.f32.mrb[21].mxu1 }
 0x2b3   :  { %761 = vst.msk [vmem:[#allocation3 + $0x10] sm:$0xf] %vm756_vm2, %v744_v1  ;;  %v745_v8 = vpack.c.bf16 %v729_v2, %v729_v2  ;;  %v671_v9 = vadd.f32 %v670_v6, %v549_v55  ;;  %v911_v10 = vpop.f32.mrb[22].mxu1 }
 0x2b4   :  { %764 = vst.msk [vmem:[#allocation3 + $0x1c] sm:$0xf] %vm756_vm2, %v747_v4  ;;  %v718_v11 = vadd.f32 %v1129_v23, %v679_v5  ;;  %v682_v12 = vadd.f32 %v911_v10, %v555_v42  ;;  %v673_v13 = vpop.f32.mrb[23].mxu1 }
 0x2b5   :  { %762 = vst.msk [vmem:[#allocation3 + $0x14] sm:$0xf] %vm756_vm2, %v745_v8  ;;  %v716_v15 = vadd.f32 %v1129_v23, %v671_v9  ;;  %v674_v16 = vadd.f32 %v673_v13, %v551_v60 }
 0x2b6   :  { %v734_v17 = vmax.f32 %v718_v11, 0.0  ;;  %v719_v18 = vadd.f32 %v1129_v23, %v682_v12 }
 0x2b7   :  { %v732_v19 = vmax.f32 %v716_v15, 0.0  ;;  %v717_v20 = vadd.f32 %v1129_v23, %v674_v16 }
 0x2b8   :  { %v750_v21 = vpack.c.bf16 %v734_v17, %v734_v17  ;;  %v735_v22 = vmax.f32 %v719_v18, 0.0 }
 0x2b9   :  { %v748_v25 = vpack.c.bf16 %v732_v19, %v732_v19  ;;  %v733_v26 = vmax.f32 %v717_v20, 0.0  ;;  %v914_v27 = vpop.f32.mrb[24].mxu1 }
 0x2ba   :  { %767 = vst.msk [vmem:[#allocation3 + $0x28] sm:$0xf] %vm756_vm2, %v750_v21  ;;  %v751_v28 = vpack.c.bf16 %v735_v22, %v735_v22  ;;  %v695_v29 = vadd.f32 %v914_v27, %v561_v24  ;;  %v686_v30 = vpop.f32.mrb[25].mxu1 }
 0x2bb   :  { %765 = vst.msk [vmem:[#allocation3 + $0x20] sm:$0xf] %vm756_vm2, %v748_v25  ;;  %v749_v32 = vpack.c.bf16 %v733_v26, %v733_v26  ;;  %v687_v33 = vadd.f32 %v686_v30, %v557_v7  ;;  %v915_v34 = vpop.f32.mrb[26].mxu1 }
 0x2bc   :  { %768 = vst.msk [vmem:[#allocation3 + $0x2c] sm:$0xf] %vm756_vm2, %v751_v28  ;;  %v722_v35 = vadd.f32 %v1129_v23, %v695_v29  ;;  %v698_v36 = vadd.f32 %v915_v34, %v563_v31  ;;  %v689_v37 = vpop.f32.mrb[27].mxu1 }
 0x2bd   :  { %766 = vst.msk [vmem:[#allocation3 + $0x24] sm:$0xf] %vm756_vm2, %v749_v32  ;;  %v720_v38 = vadd.f32 %v1129_v23, %v687_v33  ;;  %v690_v39 = vadd.f32 %v689_v37, %v559_v14 }
 0x2be   :  { %v738_v40 = vmax.f32 %v722_v35, 0.0  ;;  %v723_v41 = vadd.f32 %v1129_v23, %v698_v36 }
 0x2bf   :  { %v736_v42 = vmax.f32 %v720_v38, 0.0  ;;  %v721_v43 = vadd.f32 %v1129_v23, %v690_v39 }
 0x2c0   :  { %v754_v44 = vpack.c.bf16 %v738_v40, %v738_v40  ;;  %v739_v45 = vmax.f32 %v723_v41, 0.0 }
 0x2c1   :  { %v752_v46 = vpack.c.bf16 %v736_v42, %v736_v42  ;;  %v737_v47 = vmax.f32 %v721_v43, 0.0 }
 0x2c2   :  { %771 = vst.msk [vmem:[#allocation3 + $0x38] sm:$0xf] %vm756_vm2, %v754_v44  ;;  %v755_v48 = vpack.c.bf16 %v739_v45, %v739_v45 }
 0x2c3   :  { %769 = vst.msk [vmem:[#allocation3 + $0x30] sm:$0xf] %vm756_vm2, %v752_v46  ;;  %v753_v49 = vpack.c.bf16 %v737_v47, %v737_v47 }
 0x2c4   :  { %772 = vst.msk [vmem:[#allocation3 + $0x3c] sm:$0xf] %vm756_vm2, %v755_v48 }
 0x2c5   :  { %770 = vst.msk [vmem:[#allocation3 + $0x34] sm:$0xf] %vm756_vm2, %v753_v49 }
 0x2c6   :  { %939 = shalt.err (!%p936_p4)
}
 0x2c7   :  { %s940_s25 = scalar_lea.hbm %s1182_s7, 1024 }
 0x2c8   :  { %p941_p5 = scmp.ne.s32.totalorder %s1182_s7, %s940_s25  ;;  %p944_p6 = scmp.lt.u32.totalorder %s940_s25, %s1182_s7 }
 0x2ca   :  { %p946_p7 = pnand %p944_p6, %p941_p5 }
 0x2cc   :  { %949 = shalt.err (!%p946_p7)
}
 0x2cd   :  { %s954_s30 = smov 64   ;;  %s955_s8 = smov 4  }
 0x2ce   :  { %784 = dma.vmem_to_hbm [thread:$0]  %s779_s3, 1024, %s1182_s7, [#allocation4], %s954_s30, %s954_s30, %s955_s8  }
 0x2cf   :  { %950 = dma.done.wait [#allocation4], 1024  }
 0x2d0   :  { %951 = vsyncadd [#allocation4], 4294966272 }
 0x2d1   :  { %788 = vsyncpa [#allocation4], 1 }

</bundles_post_ra>
